<compile_context>
chip_gen: v7x
topology: tpu7x:2x2x1
jax: 0.10.0
libtpu: 0.0.40
codegen_flags: <defaults>
</compile_context>

<pallas_src>
import functools

import jax
import jax.numpy as jnp
import numpy as np
from jax import lax
from jax.experimental import pallas as pl
from jax.experimental.pallas import tpu as pltpu


# ---------------------------------------------------------------------------
# Pallas kernel: tiled (im2col-matmul conv) + folded-BN bias + ReLU
#   grid = (G, M/tm, Og/tn, K/tk); K is the innermost (arbitrary) reduction.
# ---------------------------------------------------------------------------
def _conv_bn_relu_kernel(p_ref, w_ref, b_ref, o_ref, acc_ref, *, apply_relu):
    @pl.when(pl.program_id(3) == 0)
    def _():
        acc_ref[...] = jnp.zeros_like(acc_ref)

    # bf16 x bf16 -> f32 accumulation on the MXU.
    acc_ref[...] += jnp.dot(p_ref[...], w_ref[...],
                            preferred_element_type=jnp.float32)

    @pl.when(pl.program_id(3) == pl.num_programs(3) - 1)
    def _():
        y = acc_ref[...] + b_ref[...]          # folded BN bias / conv bias
        if apply_relu:
            y = jnp.maximum(y, 0.0)
        o_ref[...] = y.astype(o_ref.dtype)


# ---------------------------------------------------------------------------
# Jitted forward: NCHW -> NHWC/bf16 -> per-group tap-major patch matrix ->
# one pallas_call over all groups -> back to NCHW.
# ---------------------------------------------------------------------------
def _basic_conv_forward(x, w_mat, bias_mat, *, kh, kw, stride, padding,
                        dilation, groups, apply_relu):
    n, c, h, wd = x.shape
    g = groups
    cg = c // g
    kgp = w_mat.shape[1]                 # padded K per group
    og = w_mat.shape[2]
    kg = cg * kh * kw                    # true K per group

    oh = (h + 2 * padding - dilation * (kh - 1) - 1) // stride + 1
    ow = (wd + 2 * padding - dilation * (kw - 1) - 1) // stride + 1
    m = n * oh * ow

    # NHWC, bf16, spatially padded once (small vs. the patch matrix).
    xh = jnp.transpose(x, (0, 2, 3, 1)).astype(jnp.bfloat16)
    xp = jnp.pad(xh, ((0, 0), (padding, padding), (padding, padding), (0, 0)))

    # Patch matrix per group, K order = (tap slow, channel fast) to match the
    # pre-permuted weight.  K zero-padding rides the same concat (no extra pass).
    group_cols = []
    for gi in range(g):
        xg = xp[..., gi * cg:(gi + 1) * cg]
        cols = []
        for ih in range(kh):
            for iw in range(kw):
                h0 = ih * dilation
                w0 = iw * dilation
                sl = xg[:, h0:h0 + stride * (oh - 1) + 1:stride,
                        w0:w0 + stride * (ow - 1) + 1:stride, :]   # (N,OH,OW,cg)
                cols.append(sl.reshape(m, cg))
        if kgp > kg:
            cols.append(jnp.zeros((m, kgp - kg), jnp.bfloat16))
        group_cols.append(jnp.concatenate(cols, axis=1))
    patches = jnp.stack(group_cols, axis=0)          # (G, M, Kgp) bf16

    # Tile sizes (clipped to full dims when small -> always legal blocks).
    tm = m if m <= 512 else 512
    tn = og if og <= 256 else 256
    tk = kgp if kgp <= 512 else 512                  # kgp is a multiple of 512 then

    grid = (g, pl.cdiv(m, tm), pl.cdiv(og, tn), kgp // tk)

    out = pl.pallas_call(
        functools.partial(_conv_bn_relu_kernel, apply_relu=apply_relu),
        out_shape=jax.ShapeDtypeStruct((g, m, og), jnp.float32),
        grid_spec=pltpu.PrefetchScalarGridSpec(
            num_scalar_prefetch=0,
            grid=grid,
            in_specs=[
                pl.BlockSpec((None, tm, tk), lambda gi, i, j, k: (gi, i, k)),
                pl.BlockSpec((None, tk, tn), lambda gi, i, j, k: (gi, k, j)),
                pl.BlockSpec((None, 1, tn), lambda gi, i, j, k: (gi, 0, j)),
            ],
            out_specs=pl.BlockSpec((None, tm, tn), lambda gi, i, j, k: (gi, i, j)),
            scratch_shapes=[pltpu.VMEM((tm, tn), jnp.float32)],
        ),
        compiler_params=pltpu.CompilerParams(
            dimension_semantics=("parallel", "parallel", "parallel", "arbitrary")),
    )(patches, w_mat, bias_mat)

    # (G, M, og) -> (N, OH, OW, G*og) -> NCHW (API boundary only).
    y = out.transpose(1, 0, 2).reshape(n, oh, ow, g * og)
    return y.transpose(0, 3, 1, 2)


# ---------------------------------------------------------------------------
# BasicConv (Conv2d -> BatchNorm2d -> ReLU) with Pallas hot path
# ---------------------------------------------------------------------------
class BasicConvPallas:
    def __init__(self, in_planes, out_planes, kernel_size, stride=1, padding=0,
                 dilation=1, groups=1, relu=True, bn=True, key=None):
        if isinstance(kernel_size, int):
            kernel_size = (kernel_size, kernel_size)
        self.in_planes = in_planes
        self.out_planes = out_planes
        self.kh, self.kw = kernel_size
        self.stride = stride
        self.padding = padding
        self.dilation = dilation
        self.groups = groups
        self.apply_relu = relu
        self.has_bn = bn

        key = jax.random.PRNGKey(0) if key is None else key
        kw_, kb_, kg_, kbe_, km_, kv_ = jax.random.split(key, 6)

        cg = in_planes // groups
        og = out_planes // groups

        # Conv2d weight: (O, Cin/groups, KH, KW); bias=False when bn=True.
        fan_in = cg * self.kh * self.kw
        bound = 1.0 / np.sqrt(fan_in)
        self.weight = jax.random.uniform(
            kw_, (out_planes, cg, self.kh, self.kw), jnp.float32, -bound, bound)

        eps = 1e-5
        if bn:
            # BatchNorm2d(affine=True), inference semantics (running stats).
            gamma = 1.0 + 0.1 * jax.random.normal(kg_, (out_planes,), jnp.float32)
            beta = 0.1 * jax.random.normal(kbe_, (out_planes,), jnp.float32)
            running_mean = 0.1 * jax.random.normal(km_, (out_planes,), jnp.float32)
            running_var = jnp.abs(jax.random.normal(kv_, (out_planes,), jnp.float32)) + 0.5
            inv_std = 1.0 / jnp.sqrt(running_var + eps)
            self.scale = gamma * inv_std                        # folded BN scale
            self.bias = beta - running_mean * gamma * inv_std   # folded BN bias
        else:
            conv_bias = jax.random.uniform(kb_, (out_planes,), jnp.float32,
                                           -bound, bound)
            self.scale = jnp.ones((out_planes,), jnp.float32)
            self.bias = conv_bias

        # ---- one-time weight prep: permute to (G, Kg, og) with K ordered
        #      (tap slow, channel fast), fold BN scale, pad K, cast to bf16.
        t = self.kh * self.kw
        kg = cg * t
        kg_pad = kg if kg <= 512 else ((kg + 511) // 512) * 512
        w5 = self.weight.reshape(groups, og, cg, self.kh, self.kw)
        wt = jnp.transpose(w5, (0, 3, 4, 2, 1)).reshape(groups, kg, og)
        wt = wt * self.scale.reshape(groups, 1, og)             # fold BN scale
        if kg_pad > kg:
            wt = jnp.pad(wt, ((0, 0), (0, kg_pad - kg), (0, 0)))
        self.w_mat = wt.astype(jnp.bfloat16)                    # (G, Kg_pad, og)
        self.bias_mat = self.bias.reshape(groups, 1, og).astype(jnp.float32)

        self._forward = jax.jit(functools.partial(
            _basic_conv_forward, kh=self.kh, kw=self.kw, stride=self.stride,
            padding=self.padding, dilation=self.dilation, groups=self.groups,
            apply_relu=self.apply_relu))

    def __call__(self, x):
        assert x.shape[1] == self.in_planes
        return self._forward(x, self.w_mat, self.bias_mat)

    # plain-JAX f32 reference (correctness check only)
    def reference(self, x):
        y = lax.conv_general_dilated(
            x, self.weight,
            window_strides=(self.stride, self.stride),
            padding=[(self.padding, self.padding)] * 2,
            rhs_dilation=(self.dilation, self.dilation),
            feature_group_count=self.groups,
            dimension_numbers=("NCHW", "OIHW", "NCHW"))
        y = y * self.scale[None, :, None, None] + self.bias[None, :, None, None]
        if self.apply_relu:
            y = jnp.maximum(y, 0.0)
        return y


if __name__ == "__main__":
    key = jax.random.PRNGKey(0)
    kx, kp, kp2 = jax.random.split(key, 3)
    x = jax.random.normal(kx, (2, 4, 16, 16), jnp.float32)   # NCHW

    # Test 1: standard conv + BN + ReLU, groups=1.
    mod = BasicConvPallas(in_planes=4, out_planes=8, kernel_size=3,
                          stride=1, padding=1, dilation=1, groups=1,
                          relu=True, bn=True, key=kp)
    y = mod(x)
    jax.block_until_ready(y)
    y_ref = mod.reference(x)
    assert y.shape == (2, 8, 16, 16), y.shape
    np.testing.assert_allclose(np.asarray(y), np.asarray(y_ref),
                               rtol=2e-2, atol=2e-2)

    # Test 2: grouped conv, stride 2, conv-bias (no BN), no ReLU.
    mod2 = BasicConvPallas(in_planes=4, out_planes=8, kernel_size=3,
                           stride=2, padding=1, dilation=1, groups=2,
                           relu=False, bn=False, key=kp2)
    y2 = mod2(x)
    jax.block_until_ready(y2)
    y2_ref = mod2.reference(x)
    assert y2.shape == (2, 8, 8, 8), y2.shape
    np.testing.assert_allclose(np.asarray(y2), np.asarray(y2_ref),
                               rtol=2e-2, atol=2e-2)

    print("KERNEL_OK")
</pallas_src>

<mosaic_0001>
module attributes {stable_mosaic.version = 11 : i64} {
  func.func @_conv_bn_relu_kernel(%arg0: i32, %arg1: i32, %arg2: i32, %arg3: i32, %arg4: memref<1x512x36xbf16, #tpu.memory_space<vmem>>, %arg5: memref<1x36x8xbf16, #tpu.memory_space<vmem>>, %arg6: memref<1x1x8xf32, #tpu.memory_space<vmem>>, %arg7: memref<1x512x8xf32, #tpu.memory_space<vmem>>, %arg8: memref<512x8xf32, #tpu.memory_space<vmem>>) attributes {dimension_semantics = [#tpu.dimension_semantics<parallel>, #tpu.dimension_semantics<parallel>, #tpu.dimension_semantics<parallel>, #tpu.dimension_semantics<arbitrary>], iteration_bounds = array<i64: 1, 1, 1, 1>, scalar_prefetch = 0 : i64, scratch_operands = 1 : i64, tpu.core_type = #tpu.core_type<tc>, window_params = [{transform_indices = @transform_0, window_bounds = array<i64: 1, 512, 36>}, {transform_indices = @transform_1, window_bounds = array<i64: 1, 36, 8>}, {transform_indices = @transform_2, window_bounds = array<i64: 1, 1, 8>}, {transform_indices = @transform_3, window_bounds = array<i64: 1, 512, 8>}]} {
    %c0_i32 = arith.constant 0 : i32
    %0 = arith.cmpi eq, %arg3, %c0_i32 : i32
    %1 = arith.extui %0 : i1 to i32
    %c0_i32_0 = arith.constant 0 : i32
    %2 = arith.cmpi ne, %1, %c0_i32_0 : i32
    scf.if %2 {
      %cst_12 = arith.constant 0.000000e+00 : f32
      %14 = vector.broadcast %cst_12 : f32 to vector<512x8xf32>
      %c0_13 = arith.constant 0 : index
      %c0_14 = arith.constant 0 : index
      %15 = vector.load %arg8[%c0_13, %c0_14] : memref<512x8xf32, #tpu.memory_space<vmem>>, vector<512x8xf32>
      tpu.vector_store %arg8[%c0_13, %c0_14], %14 {strides = array<i32>} : memref<512x8xf32, #tpu.memory_space<vmem>>, vector<512x8xf32>,
    } else {
    }
    %c0 = arith.constant 0 : index
    %c0_1 = arith.constant 0 : index
    %3 = vector.load %arg8[%c0, %c0_1] : memref<512x8xf32, #tpu.memory_space<vmem>>, vector<512x8xf32>
    %c0_2 = arith.constant 0 : index
    %c0_3 = arith.constant 0 : index
    %c0_4 = arith.constant 0 : index
    %4 = vector.load %arg4[%c0_2, %c0_3, %c0_4] : memref<1x512x36xbf16, #tpu.memory_space<vmem>>, vector<1x512x36xbf16>
    %5 = vector.shape_cast %4 : vector<1x512x36xbf16> to vector<512x36xbf16>
    %c0_5 = arith.constant 0 : index
    %c0_6 = arith.constant 0 : index
    %c0_7 = arith.constant 0 : index
    %6 = vector.load %arg5[%c0_5, %c0_6, %c0_7] : memref<1x36x8xbf16, #tpu.memory_space<vmem>>, vector<1x36x8xbf16>
    %7 = vector.shape_cast %6 : vector<1x36x8xbf16> to vector<36x8xbf16>
    %cst = arith.constant dense<0.000000e+00> : vector<512x8xf32>
    %8 = tpu.matmul %5, %7, %cst {dimension_numbers = #tpu.dot_dimension_numbers<[1], [0], [0], [1], [0, 0, 1, 1], [], []>} : vector<512x36xbf16>, vector<36x8xbf16>, vector<512x8xf32> -> vector<512x8xf32>
    %9 = arith.addf %3, %8 : vector<512x8xf32>
    %c0_8 = arith.constant 0 : index
    %c0_9 = arith.constant 0 : index
    %10 = vector.load %arg8[%c0_8, %c0_9] : memref<512x8xf32, #tpu.memory_space<vmem>>, vector<512x8xf32>
    tpu.vector_store %arg8[%c0_8, %c0_9], %9 {strides = array<i32>} : memref<512x8xf32, #tpu.memory_space<vmem>>, vector<512x8xf32>,
    %c0_i32_10 = arith.constant 0 : i32
    %11 = arith.cmpi eq, %arg3, %c0_i32_10 : i32
    %12 = arith.extui %11 : i1 to i32
    %c0_i32_11 = arith.constant 0 : i32
    %13 = arith.cmpi ne, %12, %c0_i32_11 : i32
    scf.if %13 {
      %c0_12 = arith.constant 0 : index
      %c0_13 = arith.constant 0 : index
      %14 = vector.load %arg8[%c0_12, %c0_13] : memref<512x8xf32, #tpu.memory_space<vmem>>, vector<512x8xf32>
      %c0_14 = arith.constant 0 : index
      %c0_15 = arith.constant 0 : index
      %c0_16 = arith.constant 0 : index
      %15 = vector.load %arg6[%c0_14, %c0_15, %c0_16] : memref<1x1x8xf32, #tpu.memory_space<vmem>>, vector<1x1x8xf32>
      %16 = vector.shape_cast %15 : vector<1x1x8xf32> to vector<1x8xf32>
      %17 = vector.broadcast %16 : vector<1x8xf32> to vector<512x8xf32>
      %18 = arith.addf %14, %17 : vector<512x8xf32>
      %cst_17 = arith.constant 0.000000e+00 : f32
      %19 = vector.broadcast %cst_17 : f32 to vector<512x8xf32>
      %20 = arith.maximumf %18, %19 : vector<512x8xf32>
      %c0_18 = arith.constant 0 : index
      %c0_19 = arith.constant 0 : index
      %c0_20 = arith.constant 0 : index
      %21 = vector.load %arg7[%c0_18, %c0_19, %c0_20] : memref<1x512x8xf32, #tpu.memory_space<vmem>>, vector<1x512x8xf32>
      %22 = vector.shape_cast %21 : vector<1x512x8xf32> to vector<512x8xf32>
      %23 = vector.shape_cast %20 : vector<512x8xf32> to vector<1x512x8xf32>
      tpu.vector_store %arg7[%c0_18, %c0_19, %c0_20], %23 {strides = array<i32>} : memref<1x512x8xf32, #tpu.memory_space<vmem>>, vector<1x512x8xf32>,
    } else {
    }
    return
  }
  func.func @transform_0(%arg0: i32, %arg1: i32, %arg2: i32, %arg3: i32) -> (i32, i32, i32) {
    %c0_i32 = arith.constant 0 : i32
    return %arg0, %arg1, %arg3 : i32, i32, i32
  }
  func.func @transform_1(%arg0: i32, %arg1: i32, %arg2: i32, %arg3: i32) -> (i32, i32, i32) {
    %c0_i32 = arith.constant 0 : i32
    return %arg0, %arg3, %arg2 : i32, i32, i32
  }
  func.func @transform_2(%arg0: i32, %arg1: i32, %arg2: i32, %arg3: i32) -> (i32, i32, i32) {
    %c0_i32 = arith.constant 0 : i32
    %c0_i32_0 = arith.constant 0 : i32
    return %arg0, %c0_i32, %arg2 : i32, i32, i32
  }
  func.func @transform_3(%arg0: i32, %arg1: i32, %arg2: i32, %arg3: i32) -> (i32, i32, i32) {
    %c0_i32 = arith.constant 0 : i32
    return %arg0, %arg1, %arg2 : i32, i32, i32
  }
}

</mosaic_0001>

<bundles_post_ra>
// kernel: _basic_conv_forward.1
= control target key start
LH: loop header
LB: loop body
LE: loop exit
PB: predicated region body
PF: predicated region fallthrough
CT: control target
= control target key end

     0   :  { %vm19_vm0 = vcmask 64512   ;;  %v1398_v1 = vmov 0.0   ;;  %vm392_vm1 = vcmask 293888   ;;  %vm489_vm2 = vcmask 1041408   ;;  %s2079_s1 = inlined_call_operand.vmem [shape: bf16[1,36,8], index: 1, kind: input, shape index: {}]   ;;  %s2080_s0 = inlined_call_operand.vmem [shape: bf16[1,512,36], index: 0, kind: input, shape index: {}]   ;;  %s2081_s2 = inlined_call_operand.vmem [shape: f32[1,1,8], index: 2, kind: input, shape index: {}]   ;;  %s2082_s3 = inlined_call_operand.vmem [shape: f32[1,512,8], index: 3, kind: output, shape index: {}]  }
   0x1   :  { %v1422_v0 = vld [vmem:[%s2079_s1] sm:$0xff]   ;;  %22 = vst.msk [vmem:[#allocation2 + $0x10] sm:$0xff] %vm19_vm0, %v1398_v1  ;;  %20 = vst.msk [vmem:[#allocation2] sm:$0xff] %vm19_vm0, %v1398_v1  ;;  %v1364_v2 = vld [vmem:[%s2079_s1 + $0x8] sm:$0xff]  }
   0x2   :  { %21 = vst.msk [vmem:[#allocation2 + $0x8] sm:$0xff] %vm19_vm0, %v1398_v1  ;;  %23 = vst.msk [vmem:[#allocation2 + $0x18] sm:$0xff] %vm19_vm0, %v1398_v1  ;;  %1284 = vmatprep.subr.bf16.mxu0 %v1422_v0  ;;  %1354 = vmatprep.subr.bf16.mxu1 %v1422_v0  ;;  %v1365_v3 = vld [vmem:[%s2079_s1 + $0x10] ss:$0 sps:$4 sm:$0x33]   ;;  %v1366_v4 = vld [vmem:[%s2080_s0] sm:$0xff]  }
   0x3   :  { %24 = vst.msk [vmem:[#allocation2 + $0x20] sm:$0xff] %vm19_vm0, %v1398_v1  ;;  %25 = vst.msk [vmem:[#allocation2 + $0x28] sm:$0xff] %vm19_vm0, %v1398_v1  ;;  %1285 = vmatpush3.bf16.msra.mxu0 %v1422_v0  ;;  %1357 = vmatpush3.bf16.msra.mxu1 %v1422_v0  ;;  %v1367_v5 = vld [vmem:[%s2080_s0 + $0x80] sm:$0xff]   ;;  %v491_v6 = vsel %vm489_vm2, %v1365_v3, 0  ;;  %v1368_v7 = vld [vmem:[%s2080_s0 + $0x8] sm:$0xff]  }
   0x4   :  { %26 = vst.msk [vmem:[#allocation2 + $0x30] sm:$0xff] %vm19_vm0, %v1398_v1  ;;  %27 = vst.msk [vmem:[#allocation2 + $0x38] sm:$0xff] %vm19_vm0, %v1398_v1  ;;  %1286 = vmatprep.subr.bf16.mxu0 %v1364_v2  ;;  %1355 = vmatprep.subr.bf16.mxu1 %v1364_v2  ;;  %v1369_v8 = vld [vmem:[%s2080_s0 + $0x88] sm:$0xff]   ;;  %v1370_v9 = vld [vmem:[%s2080_s0 + $0x10] sm:$0xff]  }
   0x5   :  { %28 = vst.msk [vmem:[#allocation2 + $0x40] sm:$0xff] %vm19_vm0, %v1398_v1  ;;  %29 = vst.msk [vmem:[#allocation2 + $0x48] sm:$0xff] %vm19_vm0, %v1398_v1  ;;  %1290 = vmatprep.mubr.msk.bf16.mxu0 %vm392_vm1, %v1366_v4  ;;  %1322 = vmatprep.mubr.msk.bf16.mxu1 %vm392_vm1, %v1367_v5  ;;  %v1371_v10 = vld [vmem:[%s2080_s0 + $0x90] sm:$0xff]   ;;  %v1372_v11 = vld [vmem:[%s2080_s0 + $0x18] sm:$0xff]  }
   0x6   :  { %30 = vst.msk [vmem:[#allocation2 + $0x50] sm:$0xff] %vm19_vm0, %v1398_v1  ;;  %31 = vst.msk [vmem:[#allocation2 + $0x58] sm:$0xff] %vm19_vm0, %v1398_v1  ;;  %v1373_v12 = vld [vmem:[%s2080_s0 + $0x98] sm:$0xff]   ;;  %v1374_v13 = vld [vmem:[%s2080_s0 + $0x20] sm:$0xff]  }
   0x7   :  { %32 = vst.msk [vmem:[#allocation2 + $0x60] sm:$0xff] %vm19_vm0, %v1398_v1  ;;  %33 = vst.msk [vmem:[#allocation2 + $0x68] sm:$0xff] %vm19_vm0, %v1398_v1  ;;  %1287 = vmatpush3.bf16.msra.mxu0 %v1364_v2  ;;  %1358 = vmatpush3.bf16.msra.mxu1 %v1364_v2  ;;  %v1375_v14 = vld [vmem:[%s2080_s0 + $0xa0] sm:$0xff]   ;;  %v1376_v15 = vld [vmem:[%s2080_s0 + $0x28] sm:$0xff]  }
   0x8   :  { %34 = vst.msk [vmem:[#allocation2 + $0x70] sm:$0xff] %vm19_vm0, %v1398_v1  ;;  %35 = vst.msk [vmem:[#allocation2 + $0x78] sm:$0xff] %vm19_vm0, %v1398_v1  ;;  %1360 = vmatprep.subr.msk.bf16.mxu0 %vm489_vm2, %v1365_v3  ;;  %1361 = vmatprep.subr.msk.bf16.mxu1 %vm489_vm2, %v1365_v3  ;;  %v1377_v16 = vld [vmem:[%s2080_s0 + $0xa8] sm:$0xff]   ;;  %v1378_v17 = vld [vmem:[%s2080_s0 + $0x30] sm:$0xff]  }
   0x9   :  { %36 = vst.msk [vmem:[#allocation2 + $0x80] sm:$0xff] %vm19_vm0, %v1398_v1  ;;  %37 = vst.msk [vmem:[#allocation2 + $0x88] sm:$0xff] %vm19_vm0, %v1398_v1  ;;  %v1379_v18 = vld [vmem:[%s2080_s0 + $0xb0] sm:$0xff]   ;;  %v1380_v19 = vld [vmem:[%s2080_s0 + $0x38] sm:$0xff]  }
   0xa   :  { %38 = vst.msk [vmem:[#allocation2 + $0x90] sm:$0xff] %vm19_vm0, %v1398_v1  ;;  %39 = vst.msk [vmem:[#allocation2 + $0x98] sm:$0xff] %vm19_vm0, %v1398_v1  ;;  %v1381_v20 = vld [vmem:[%s2080_s0 + $0xb8] sm:$0xff]   ;;  %v1382_v21 = vld [vmem:[%s2080_s0 + $0x40] sm:$0xff]  }
   0xb   :  { %40 = vst.msk [vmem:[#allocation2 + $0xa0] sm:$0xff] %vm19_vm0, %v1398_v1  ;;  %41 = vst.msk [vmem:[#allocation2 + $0xa8] sm:$0xff] %vm19_vm0, %v1398_v1  ;;  %1289 = vmatpush3.bf16.msra.mxu0 %v491_v6  ;;  %1359 = vmatpush3.bf16.msra.mxu1 %v491_v6  ;;  %v1383_v22 = vld [vmem:[%s2080_s0 + $0xc0] sm:$0xff]   ;;  %v1384_v23 = vld [vmem:[%s2080_s0 + $0x48] sm:$0xff]  }
   0xc   :  { %42 = vst.msk [vmem:[#allocation2 + $0xb0] sm:$0xff] %vm19_vm0, %v1398_v1  ;;  %43 = vst.msk [vmem:[#allocation2 + $0xb8] sm:$0xff] %vm19_vm0, %v1398_v1  ;;  %v1385_v24 = vld [vmem:[%s2080_s0 + $0xc8] sm:$0xff]   ;;  %v1386_v25 = vld [vmem:[%s2080_s0 + $0x50] sm:$0xff]  }
   0xd   :  { %44 = vst.msk [vmem:[#allocation2 + $0xc0] sm:$0xff] %vm19_vm0, %v1398_v1  ;;  %45 = vst.msk [vmem:[#allocation2 + $0xc8] sm:$0xff] %vm19_vm0, %v1398_v1  ;;  %v1387_v26 = vld [vmem:[%s2080_s0 + $0xd0] sm:$0xff]   ;;  %v1388_v27 = vld [vmem:[%s2080_s0 + $0x58] sm:$0xff]  }
   0xe   :  { %46 = vst.msk [vmem:[#allocation2 + $0xd0] sm:$0xff] %vm19_vm0, %v1398_v1  ;;  %47 = vst.msk [vmem:[#allocation2 + $0xd8] sm:$0xff] %vm19_vm0, %v1398_v1  ;;  %1291 = vmatmul.mubr.msk.bf16.vlgmr.msra.gmra.mrb[0].mxu0 %vm392_vm1, %v1368_v7  ;;  %1323 = vmatmul.mubr.msk.bf16.vlgmr.msra.gmra.mrb[0].mxu1 %vm392_vm1, %v1369_v8  ;;  %v1389_v28 = vld [vmem:[%s2080_s0 + $0xd8] sm:$0xff]   ;;  %v1390_v29 = vld [vmem:[%s2080_s0 + $0x60] sm:$0xff]  }
   0xf   :  { %48 = vst.msk [vmem:[#allocation2 + $0xe0] sm:$0xff] %vm19_vm0, %v1398_v1  ;;  %49 = vst.msk [vmem:[#allocation2 + $0xe8] sm:$0xff] %vm19_vm0, %v1398_v1  ;;  %1294 = vmatprep.mubr.msk.bf16.mxu0 %vm392_vm1, %v1370_v9  ;;  %1326 = vmatprep.mubr.msk.bf16.mxu1 %vm392_vm1, %v1371_v10  ;;  %v1391_v30 = vld [vmem:[%s2080_s0 + $0xe0] sm:$0xff]   ;;  %v1392_v31 = vld [vmem:[%s2080_s0 + $0x68] sm:$0xff]  }
  0x10   :  { %50 = vst.msk [vmem:[#allocation2 + $0xf0] sm:$0xff] %vm19_vm0, %v1398_v1  ;;  %51 = vst.msk [vmem:[#allocation2 + $0xf8] sm:$0xff] %vm19_vm0, %v1398_v1  ;;  %v1393_v32 = vld [vmem:[%s2080_s0 + $0xe8] sm:$0xff]   ;;  %v1394_v33 = vld [vmem:[%s2080_s0 + $0x70] sm:$0xff]  }
  0x11   :  { %52 = vst.msk [vmem:[#allocation2 + $0x100] sm:$0xff] %vm19_vm0, %v1398_v1  ;;  %53 = vst.msk [vmem:[#allocation2 + $0x108] sm:$0xff] %vm19_vm0, %v1398_v1  ;;  %v1395_v34 = vld [vmem:[%s2080_s0 + $0xf0] sm:$0xff]   ;;  %v1396_v35 = vld [vmem:[%s2080_s0 + $0x78] sm:$0xff]  }
  0x12   :  { %54 = vst.msk [vmem:[#allocation2 + $0x110] sm:$0xff] %vm19_vm0, %v1398_v1  ;;  %55 = vst.msk [vmem:[#allocation2 + $0x118] sm:$0xff] %vm19_vm0, %v1398_v1  ;;  %v1397_v36 = vld [vmem:[%s2080_s0 + $0xf8] sm:$0xff]   ;;  %v86_v37 = vld [vmem:[#allocation2 + $0x10] sm:$0xff] }
  0x13   :  { %56 = vst.msk [vmem:[#allocation2 + $0x120] sm:$0xff] %vm19_vm0, %v1398_v1  ;;  %57 = vst.msk [vmem:[#allocation2 + $0x128] sm:$0xff] %vm19_vm0, %v1398_v1  ;;  %v84_v39 = vld [vmem:[#allocation2] sm:$0xff]  ;;  %v87_v43 = vld [vmem:[#allocation2 + $0x18] sm:$0xff] }
  0x14   :  { %58 = vst.msk [vmem:[#allocation2 + $0x130] sm:$0xff] %vm19_vm0, %v1398_v1  ;;  %59 = vst.msk [vmem:[#allocation2 + $0x138] sm:$0xff] %vm19_vm0, %v1398_v1  ;;  %v85_v49 = vld [vmem:[#allocation2 + $0x8] sm:$0xff]  ;;  %v90_v61 = vld [vmem:[#allocation2 + $0x30] sm:$0xff] }
  0x15   :  { %60 = vst.msk [vmem:[#allocation2 + $0x140] sm:$0xff] %vm19_vm0, %v1398_v1  ;;  %61 = vst.msk [vmem:[#allocation2 + $0x148] sm:$0xff] %vm19_vm0, %v1398_v1  ;;  %v88_v63 = vld [vmem:[#allocation2 + $0x20] sm:$0xff]  ;;  %v91_v4 = vld [vmem:[#allocation2 + $0x38] sm:$0xff] }
  0x16   :  { %62 = vst.msk [vmem:[#allocation2 + $0x150] sm:$0xff] %vm19_vm0, %v1398_v1  ;;  %63 = vst.msk [vmem:[#allocation2 + $0x158] sm:$0xff] %vm19_vm0, %v1398_v1  ;;  %1295 = vmatmul.mubr.msk.bf16.gmra.mrb[4].mxu0 %vm392_vm1, %v1372_v11  ;;  %1327 = vmatmul.mubr.msk.bf16.gmra.mrb[4].mxu1 %vm392_vm1, %v1373_v12  ;;  %v89_v10 = vld [vmem:[#allocation2 + $0x28] sm:$0xff] }
  0x17   :  { %64 = vst.msk [vmem:[#allocation2 + $0x160] sm:$0xff] %vm19_vm0, %v1398_v1  ;;  %65 = vst.msk [vmem:[#allocation2 + $0x168] sm:$0xff] %vm19_vm0, %v1398_v1  ;;  %1298 = vmatprep.mubr.msk.bf16.mxu0 %vm392_vm1, %v1374_v13  ;;  %1330 = vmatprep.mubr.msk.bf16.mxu1 %vm392_vm1, %v1375_v14 }
  0x18   :  { %66 = vst.msk [vmem:[#allocation2 + $0x170] sm:$0xff] %vm19_vm0, %v1398_v1  ;;  %67 = vst.msk [vmem:[#allocation2 + $0x178] sm:$0xff] %vm19_vm0, %v1398_v1  ;;  %v116_v40 = vld [vmem:[#allocation2 + $0x100] sm:$0xff]  ;;  %v117_v50 = vld [vmem:[#allocation2 + $0x108] sm:$0xff] }
  0x19   :  { %68 = vst.msk [vmem:[#allocation2 + $0x180] sm:$0xff] %vm19_vm0, %v1398_v1  ;;  %69 = vst.msk [vmem:[#allocation2 + $0x188] sm:$0xff] %vm19_vm0, %v1398_v1  ;;  %v118_v38 = vld [vmem:[#allocation2 + $0x110] sm:$0xff]  ;;  %v119_v44 = vld [vmem:[#allocation2 + $0x118] sm:$0xff] }
  0x1a   :  { %70 = vst.msk [vmem:[#allocation2 + $0x190] sm:$0xff] %vm19_vm0, %v1398_v1  ;;  %71 = vst.msk [vmem:[#allocation2 + $0x198] sm:$0xff] %vm19_vm0, %v1398_v1  ;;  %v120_v0 = vld [vmem:[#allocation2 + $0x120] sm:$0xff]  ;;  %v121_v11 = vld [vmem:[#allocation2 + $0x128] sm:$0xff] }
  0x1b   :  { %72 = vst.msk [vmem:[#allocation2 + $0x1a0] sm:$0xff] %vm19_vm0, %v1398_v1  ;;  %73 = vst.msk [vmem:[#allocation2 + $0x1a8] sm:$0xff] %vm19_vm0, %v1398_v1  ;;  %v122_v62 = vld [vmem:[#allocation2 + $0x130] sm:$0xff]  ;;  %v123_v5 = vld [vmem:[#allocation2 + $0x138] sm:$0xff] }
  0x1c   :  { %74 = vst.msk [vmem:[#allocation2 + $0x1b0] sm:$0xff] %vm19_vm0, %v1398_v1  ;;  %75 = vst.msk [vmem:[#allocation2 + $0x1b8] sm:$0xff] %vm19_vm0, %v1398_v1 }
  0x1d   :  { %76 = vst.msk [vmem:[#allocation2 + $0x1c0] sm:$0xff] %vm19_vm0, %v1398_v1  ;;  %77 = vst.msk [vmem:[#allocation2 + $0x1c8] sm:$0xff] %vm19_vm0, %v1398_v1 }
  0x1e   :  { %78 = vst.msk [vmem:[#allocation2 + $0x1d0] sm:$0xff] %vm19_vm0, %v1398_v1  ;;  %79 = vst.msk [vmem:[#allocation2 + $0x1d8] sm:$0xff] %vm19_vm0, %v1398_v1  ;;  %1299 = vmatmul.mubr.msk.bf16.gmra.mrb[8].mxu0 %vm392_vm1, %v1376_v15  ;;  %1331 = vmatmul.mubr.msk.bf16.gmra.mrb[8].mxu1 %vm392_vm1, %v1377_v16 }
  0x1f   :  { %80 = vst.msk [vmem:[#allocation2 + $0x1e0] sm:$0xff] %vm19_vm0, %v1398_v1  ;;  %81 = vst.msk [vmem:[#allocation2 + $0x1e8] sm:$0xff] %vm19_vm0, %v1398_v1  ;;  %1302 = vmatprep.mubr.msk.bf16.mxu0 %vm392_vm1, %v1378_v17  ;;  %1334 = vmatprep.mubr.msk.bf16.mxu1 %vm392_vm1, %v1379_v18 }
  0x20   :  { %82 = vst.msk [vmem:[#allocation2 + $0x1f0] sm:$0xff] %vm19_vm0, %v1398_v1  ;;  %83 = vst.msk [vmem:[#allocation2 + $0x1f8] sm:$0xff] %vm19_vm0, %v1398_v1  ;;  %v1701_v1 = vld [vmem:[%s2081_s2] ss:$0 sm:$0xff] }
  0x26   :  { %1303 = vmatmul.mubr.msk.bf16.gmra.mrb[12].mxu0 %vm392_vm1, %v1380_v19  ;;  %1335 = vmatmul.mubr.msk.bf16.gmra.mrb[12].mxu1 %vm392_vm1, %v1381_v20 }
  0x27   :  { %1306 = vmatprep.mubr.msk.bf16.mxu0 %vm392_vm1, %v1382_v21  ;;  %1338 = vmatprep.mubr.msk.bf16.mxu1 %vm392_vm1, %v1383_v22 }
  0x2e   :  { %1307 = vmatmul.mubr.msk.bf16.gmra.mrb[16].mxu0 %vm392_vm1, %v1384_v23  ;;  %1339 = vmatmul.mubr.msk.bf16.gmra.mrb[16].mxu1 %vm392_vm1, %v1385_v24 }
  0x2f   :  { %1310 = vmatprep.mubr.msk.bf16.mxu0 %vm392_vm1, %v1386_v25  ;;  %1342 = vmatprep.mubr.msk.bf16.mxu1 %vm392_vm1, %v1387_v26 }
  0x36   :  { %1311 = vmatmul.mubr.msk.bf16.gmra.mrb[20].mxu0 %vm392_vm1, %v1388_v27  ;;  %1343 = vmatmul.mubr.msk.bf16.gmra.mrb[20].mxu1 %vm392_vm1, %v1389_v28 }
  0x37   :  { %1314 = vmatprep.mubr.msk.bf16.mxu0 %vm392_vm1, %v1390_v29  ;;  %1346 = vmatprep.mubr.msk.bf16.mxu1 %vm392_vm1, %v1391_v30 }
  0x3e   :  { %1315 = vmatmul.mubr.msk.bf16.gmra.mrb[24].mxu0 %vm392_vm1, %v1392_v31  ;;  %1347 = vmatmul.mubr.msk.bf16.gmra.mrb[24].mxu1 %vm392_vm1, %v1393_v32 }
  0x3f   :  { %1318 = vmatprep.mubr.msk.bf16.mxu0 %vm392_vm1, %v1394_v33  ;;  %1350 = vmatprep.mubr.msk.bf16.mxu1 %vm392_vm1, %v1395_v34 }
  0x46   :  { %1319 = vmatmul.mubr.msk.bf16.gmra.mrb[28].mxu0 %vm392_vm1, %v1396_v35  ;;  %1351 = vmatmul.mubr.msk.bf16.gmra.mrb[28].mxu1 %vm392_vm1, %v1397_v36 }
  0xe1   :  { %v1292_v41 = vpop.f32.mrb[0].mxu0  ;;  %v1324_v42 = vpop.f32.mrb[0].mxu1 }
  0xe2   :  { %v784_v45 = vadd.f32 %v1292_v41, %v86_v37  ;;  %v816_v46 = vadd.f32 %v1324_v42, %v118_v38  ;;  %v527_v47 = vpop.f32.mrb[1].mxu0  ;;  %v655_v48 = vpop.f32.mrb[1].mxu1  ;;  %v94_v42 = vld [vmem:[#allocation2 + $0x50] sm:$0xff] }
  0xe3   :  { %v782_v51 = vadd.f32 %v527_v47, %v84_v39  ;;  %v814_v52 = vadd.f32 %v655_v48, %v116_v40  ;;  %v1293_v53 = vpop.f32.mrb[2].mxu0  ;;  %v1325_v54 = vpop.f32.mrb[2].mxu1  ;;  %v124_v47 = vld [vmem:[#allocation2 + $0x140] sm:$0xff] }
  0xe4   :  { %849 = vst.msk [vmem:[#allocation2 + $0x10] sm:$0xff] %vm19_vm0, %v784_v45  ;;  %881 = vst.msk [vmem:[#allocation2 + $0x110] sm:$0xff] %vm19_vm0, %v816_v46  ;;  %v785_v55 = vadd.f32 %v1293_v53, %v87_v43  ;;  %v817_v56 = vadd.f32 %v1325_v54, %v119_v44  ;;  %v530_v57 = vpop.f32.mrb[3].mxu0  ;;  %v658_v58 = vpop.f32.mrb[3].mxu1  ;;  %v126_v43 = vld [vmem:[#allocation2 + $0x150] sm:$0xff]  ;;  %v92_v46 = vld [vmem:[#allocation2 + $0x40] sm:$0xff] }
  0xe5   :  { %847 = vst.msk [vmem:[#allocation2] sm:$0xff] %vm19_vm0, %v782_v51  ;;  %879 = vst.msk [vmem:[#allocation2 + $0x100] sm:$0xff] %vm19_vm0, %v814_v52  ;;  %v783_v59 = vadd.f32 %v530_v57, %v85_v49  ;;  %v815_v60 = vadd.f32 %v658_v58, %v117_v50  ;;  %v95_v52 = vld [vmem:[#allocation2 + $0x58] sm:$0xff]  ;;  %v93_v58 = vld [vmem:[#allocation2 + $0x48] sm:$0xff] }
  0xe6   :  { %850 = vst.msk [vmem:[#allocation2 + $0x18] sm:$0xff] %vm19_vm0, %v785_v55  ;;  %882 = vst.msk [vmem:[#allocation2 + $0x118] sm:$0xff] %vm19_vm0, %v817_v56  ;;  %v127_v53 = vld [vmem:[#allocation2 + $0x158] sm:$0xff] }
  0xe7   :  { %848 = vst.msk [vmem:[#allocation2 + $0x8] sm:$0xff] %vm19_vm0, %v783_v59  ;;  %880 = vst.msk [vmem:[#allocation2 + $0x108] sm:$0xff] %vm19_vm0, %v815_v60  ;;  %v125_v59 = vld [vmem:[#allocation2 + $0x148] sm:$0xff] }
  0xe9   :  { %v1296_v2 = vpop.f32.mrb[4].mxu0  ;;  %v1328_v3 = vpop.f32.mrb[4].mxu1 }
  0xea   :  { %v788_v6 = vadd.f32 %v1296_v2, %v90_v61  ;;  %v820_v7 = vadd.f32 %v1328_v3, %v122_v62  ;;  %v543_v8 = vpop.f32.mrb[5].mxu0  ;;  %v671_v9 = vpop.f32.mrb[5].mxu1 }
  0xeb   :  { %v916_v12 = vld [vmem:[#allocation2 + $0x10] sm:$0xff]  ;;  %v786_v14 = vadd.f32 %v543_v8, %v88_v63  ;;  %v818_v15 = vadd.f32 %v671_v9, %v120_v0  ;;  %v1297_v16 = vpop.f32.mrb[6].mxu0  ;;  %v1329_v17 = vpop.f32.mrb[6].mxu1 }
  0xec   :  { %v948_v13 = vld [vmem:[#allocation2 + $0x110] sm:$0xff]  ;;  %v987_v18 = vadd.f32 %v1701_v1, %v916_v12  ;;  %v914_v20 = vld [vmem:[#allocation2] sm:$0xff]  ;;  %853 = vst.msk [vmem:[#allocation2 + $0x30] sm:$0xff] %vm19_vm0, %v788_v6  ;;  %885 = vst.msk [vmem:[#allocation2 + $0x130] sm:$0xff] %vm19_vm0, %v820_v7  ;;  %v789_v22 = vadd.f32 %v1297_v16, %v91_v4  ;;  %v821_v23 = vadd.f32 %v1329_v17, %v123_v5  ;;  %v546_v24 = vpop.f32.mrb[7].mxu0  ;;  %v674_v25 = vpop.f32.mrb[7].mxu1 }
  0xed   :  { %v1019_v19 = vadd.f32 %v1701_v1, %v948_v13  ;;  %v946_v21 = vld [vmem:[#allocation2 + $0x100] sm:$0xff]  ;;  %v985_v26 = vadd.f32 %v1701_v1, %v914_v20  ;;  %v917_v28 = vld [vmem:[#allocation2 + $0x18] sm:$0xff]  ;;  %851 = vst.msk [vmem:[#allocation2 + $0x20] sm:$0xff] %vm19_vm0, %v786_v14  ;;  %883 = vst.msk [vmem:[#allocation2 + $0x120] sm:$0xff] %vm19_vm0, %v818_v15  ;;  %v787_v30 = vadd.f32 %v546_v24, %v89_v10 }
  0xee   :  { %v1017_v27 = vadd.f32 %v1701_v1, %v946_v21  ;;  %v949_v29 = vld [vmem:[#allocation2 + $0x118] sm:$0xff]  ;;  %v819_v31 = vadd.f32 %v674_v25, %v121_v11  ;;  %v1051_v32 = vmax.f32 %v987_v18, 0.0  ;;  %v988_v34 = vadd.f32 %v1701_v1, %v917_v28  ;;  %v915_v36 = vld [vmem:[#allocation2 + $0x8] sm:$0xff]  ;;  %854 = vst.msk [vmem:[#allocation2 + $0x38] sm:$0xff] %vm19_vm0, %v789_v22  ;;  %886 = vst.msk [vmem:[#allocation2 + $0x138] sm:$0xff] %vm19_vm0, %v821_v23 }
  0xef   :  { %v1083_v33 = vmax.f32 %v1019_v19, 0.0  ;;  %v1020_v35 = vadd.f32 %v1701_v1, %v949_v29  ;;  %v947_v37 = vld [vmem:[#allocation2 + $0x108] sm:$0xff]  ;;  %v1049_v38 = vmax.f32 %v985_v26, 0.0  ;;  %v986_v40 = vadd.f32 %v1701_v1, %v915_v36  ;;  %852 = vst.msk [vmem:[#allocation2 + $0x28] sm:$0xff] %vm19_vm0, %v787_v30  ;;  %v130_v28 = vld [vmem:[#allocation2 + $0x170] sm:$0xff] }
  0xf0   :  { %v1081_v39 = vmax.f32 %v1017_v27, 0.0  ;;  %v1018_v41 = vadd.f32 %v1701_v1, %v947_v37  ;;  %884 = vst.msk [vmem:[#allocation2 + $0x128] sm:$0xff] %vm19_vm0, %v819_v31  ;;  %1115 = vst.msk [vmem:[%s2082_s3 + $0x10] sm:$0xff] %vm19_vm0, %v1051_v32  ;;  %v1052_v44 = vmax.f32 %v988_v34, 0.0  ;;  %v98_v27 = vld [vmem:[#allocation2 + $0x70] sm:$0xff]  ;;  %v96_v31 = vld [vmem:[#allocation2 + $0x60] sm:$0xff] }
  0xf1   :  { %1147 = vst.msk [vmem:[%s2082_s3 + $0x110] sm:$0xff] %vm19_vm0, %v1083_v33  ;;  %v1084_v45 = vmax.f32 %v1020_v35, 0.0  ;;  %1113 = vst.msk [vmem:[%s2082_s3] sm:$0xff] %vm19_vm0, %v1049_v38  ;;  %v1050_v48 = vmax.f32 %v986_v40, 0.0  ;;  %v1300_v50 = vpop.f32.mrb[8].mxu0  ;;  %v1332_v51 = vpop.f32.mrb[8].mxu1 }
  0xf2   :  { %1145 = vst.msk [vmem:[%s2082_s3 + $0x100] sm:$0xff] %vm19_vm0, %v1081_v39  ;;  %v1082_v49 = vmax.f32 %v1018_v41, 0.0  ;;  %1116 = vst.msk [vmem:[%s2082_s3 + $0x18] sm:$0xff] %vm19_vm0, %v1052_v44  ;;  %v792_v54 = vadd.f32 %v1300_v50, %v94_v42  ;;  %v824_v55 = vadd.f32 %v1332_v51, %v126_v43  ;;  %v559_v56 = vpop.f32.mrb[9].mxu0  ;;  %v687_v57 = vpop.f32.mrb[9].mxu1  ;;  %v128_v32 = vld [vmem:[#allocation2 + $0x160] sm:$0xff] }
  0xf3   :  { %1148 = vst.msk [vmem:[%s2082_s3 + $0x118] sm:$0xff] %vm19_vm0, %v1084_v45  ;;  %1114 = vst.msk [vmem:[%s2082_s3 + $0x8] sm:$0xff] %vm19_vm0, %v1050_v48  ;;  %v920_v60 = vld [vmem:[#allocation2 + $0x30] sm:$0xff]  ;;  %v790_v62 = vadd.f32 %v559_v56, %v92_v46  ;;  %v822_v63 = vadd.f32 %v687_v57, %v124_v47  ;;  %v1301_v0 = vpop.f32.mrb[10].mxu0  ;;  %v1333_v2 = vpop.f32.mrb[10].mxu1  ;;  %v99_v37 = vld [vmem:[#allocation2 + $0x78] sm:$0xff] }
  0xf4   :  { %1146 = vst.msk [vmem:[%s2082_s3 + $0x108] sm:$0xff] %vm19_vm0, %v1082_v49  ;;  %v952_v61 = vld [vmem:[#allocation2 + $0x130] sm:$0xff]  ;;  %v991_v3 = vadd.f32 %v1701_v1, %v920_v60  ;;  %v918_v5 = vld [vmem:[#allocation2 + $0x20] sm:$0xff]  ;;  %857 = vst.msk [vmem:[#allocation2 + $0x50] sm:$0xff] %vm19_vm0, %v792_v54  ;;  %v793_v7 = vadd.f32 %v1301_v0, %v95_v52  ;;  %v825_v8 = vadd.f32 %v1333_v2, %v127_v53  ;;  %v562_v9 = vpop.f32.mrb[11].mxu0  ;;  %v690_v10 = vpop.f32.mrb[11].mxu1 }
  0xf5   :  { %v1023_v4 = vadd.f32 %v1701_v1, %v952_v61  ;;  %v950_v6 = vld [vmem:[#allocation2 + $0x120] sm:$0xff]  ;;  %889 = vst.msk [vmem:[#allocation2 + $0x150] sm:$0xff] %vm19_vm0, %v824_v55  ;;  %v989_v11 = vadd.f32 %v1701_v1, %v918_v5  ;;  %v921_v13 = vld [vmem:[#allocation2 + $0x38] sm:$0xff]  ;;  %855 = vst.msk [vmem:[#allocation2 + $0x40] sm:$0xff] %vm19_vm0, %v790_v62  ;;  %v791_v15 = vadd.f32 %v562_v9, %v93_v58 }
  0xf6   :  { %v1021_v12 = vadd.f32 %v1701_v1, %v950_v6  ;;  %v953_v14 = vld [vmem:[#allocation2 + $0x138] sm:$0xff]  ;;  %887 = vst.msk [vmem:[#allocation2 + $0x140] sm:$0xff] %vm19_vm0, %v822_v63  ;;  %v823_v16 = vadd.f32 %v690_v10, %v125_v59  ;;  %v1055_v17 = vmax.f32 %v991_v3, 0.0  ;;  %v992_v19 = vadd.f32 %v1701_v1, %v921_v13  ;;  %v919_v21 = vld [vmem:[#allocation2 + $0x28] sm:$0xff]  ;;  %858 = vst.msk [vmem:[#allocation2 + $0x58] sm:$0xff] %vm19_vm0, %v793_v7 }
  0xf7   :  { %v1087_v18 = vmax.f32 %v1023_v4, 0.0  ;;  %v1024_v20 = vadd.f32 %v1701_v1, %v953_v14  ;;  %v951_v22 = vld [vmem:[#allocation2 + $0x128] sm:$0xff]  ;;  %890 = vst.msk [vmem:[#allocation2 + $0x158] sm:$0xff] %vm19_vm0, %v825_v8  ;;  %v1053_v23 = vmax.f32 %v989_v11, 0.0  ;;  %v990_v25 = vadd.f32 %v1701_v1, %v919_v21  ;;  %856 = vst.msk [vmem:[#allocation2 + $0x48] sm:$0xff] %vm19_vm0, %v791_v15  ;;  %v131_v38 = vld [vmem:[#allocation2 + $0x178] sm:$0xff] }
  0xf8   :  { %v1085_v24 = vmax.f32 %v1021_v12, 0.0  ;;  %v1022_v26 = vadd.f32 %v1701_v1, %v951_v22  ;;  %888 = vst.msk [vmem:[#allocation2 + $0x148] sm:$0xff] %vm19_vm0, %v823_v16  ;;  %1119 = vst.msk [vmem:[%s2082_s3 + $0x30] sm:$0xff] %vm19_vm0, %v1055_v17  ;;  %v1056_v29 = vmax.f32 %v992_v19, 0.0  ;;  %v97_v43 = vld [vmem:[#allocation2 + $0x68] sm:$0xff]  ;;  %v102_v12 = vld [vmem:[#allocation2 + $0x90] sm:$0xff] }
  0xf9   :  { %1151 = vst.msk [vmem:[%s2082_s3 + $0x130] sm:$0xff] %vm19_vm0, %v1087_v18  ;;  %v1088_v30 = vmax.f32 %v1024_v20, 0.0  ;;  %1117 = vst.msk [vmem:[%s2082_s3 + $0x20] sm:$0xff] %vm19_vm0, %v1053_v23  ;;  %v1054_v33 = vmax.f32 %v990_v25, 0.0  ;;  %v1304_v35 = vpop.f32.mrb[12].mxu0  ;;  %v1336_v36 = vpop.f32.mrb[12].mxu1 }
  0xfa   :  { %1149 = vst.msk [vmem:[%s2082_s3 + $0x120] sm:$0xff] %vm19_vm0, %v1085_v24  ;;  %v1086_v34 = vmax.f32 %v1022_v26, 0.0  ;;  %1120 = vst.msk [vmem:[%s2082_s3 + $0x38] sm:$0xff] %vm19_vm0, %v1056_v29  ;;  %v796_v39 = vadd.f32 %v1304_v35, %v98_v27  ;;  %v828_v40 = vadd.f32 %v1336_v36, %v130_v28  ;;  %v575_v41 = vpop.f32.mrb[13].mxu0  ;;  %v703_v42 = vpop.f32.mrb[13].mxu1  ;;  %v129_v44 = vld [vmem:[#allocation2 + $0x168] sm:$0xff] }
  0xfb   :  { %1152 = vst.msk [vmem:[%s2082_s3 + $0x138] sm:$0xff] %vm19_vm0, %v1088_v30  ;;  %1118 = vst.msk [vmem:[%s2082_s3 + $0x28] sm:$0xff] %vm19_vm0, %v1054_v33  ;;  %v924_v45 = vld [vmem:[#allocation2 + $0x50] sm:$0xff]  ;;  %v794_v47 = vadd.f32 %v575_v41, %v96_v31  ;;  %v826_v48 = vadd.f32 %v703_v42, %v128_v32  ;;  %v1305_v49 = vpop.f32.mrb[14].mxu0  ;;  %v1337_v50 = vpop.f32.mrb[14].mxu1  ;;  %v100_v16 = vld [vmem:[#allocation2 + $0x80] sm:$0xff] }
  0xfc   :  { %1150 = vst.msk [vmem:[%s2082_s3 + $0x128] sm:$0xff] %vm19_vm0, %v1086_v34  ;;  %v956_v46 = vld [vmem:[#allocation2 + $0x150] sm:$0xff]  ;;  %v995_v51 = vadd.f32 %v1701_v1, %v924_v45  ;;  %v922_v53 = vld [vmem:[#allocation2 + $0x40] sm:$0xff]  ;;  %861 = vst.msk [vmem:[#allocation2 + $0x70] sm:$0xff] %vm19_vm0, %v796_v39  ;;  %v797_v55 = vadd.f32 %v1305_v49, %v99_v37  ;;  %v829_v56 = vadd.f32 %v1337_v50, %v131_v38  ;;  %v578_v57 = vpop.f32.mrb[15].mxu0  ;;  %v706_v58 = vpop.f32.mrb[15].mxu1 }
  0xfd   :  { %v1027_v52 = vadd.f32 %v1701_v1, %v956_v46  ;;  %v954_v54 = vld [vmem:[#allocation2 + $0x140] sm:$0xff]  ;;  %893 = vst.msk [vmem:[#allocation2 + $0x170] sm:$0xff] %vm19_vm0, %v828_v40  ;;  %v993_v59 = vadd.f32 %v1701_v1, %v922_v53  ;;  %v925_v61 = vld [vmem:[#allocation2 + $0x58] sm:$0xff]  ;;  %859 = vst.msk [vmem:[#allocation2 + $0x60] sm:$0xff] %vm19_vm0, %v794_v47  ;;  %v795_v63 = vadd.f32 %v578_v57, %v97_v43 }
  0xfe   :  { %v1025_v60 = vadd.f32 %v1701_v1, %v954_v54  ;;  %v957_v62 = vld [vmem:[#allocation2 + $0x158] sm:$0xff]  ;;  %891 = vst.msk [vmem:[#allocation2 + $0x160] sm:$0xff] %vm19_vm0, %v826_v48  ;;  %v827_v0 = vadd.f32 %v706_v58, %v129_v44  ;;  %v1059_v2 = vmax.f32 %v995_v51, 0.0  ;;  %v996_v4 = vadd.f32 %v1701_v1, %v925_v61  ;;  %v923_v6 = vld [vmem:[#allocation2 + $0x48] sm:$0xff]  ;;  %862 = vst.msk [vmem:[#allocation2 + $0x78] sm:$0xff] %vm19_vm0, %v797_v55 }
  0xff   :  { %v1091_v3 = vmax.f32 %v1027_v52, 0.0  ;;  %v1028_v5 = vadd.f32 %v1701_v1, %v957_v62  ;;  %v955_v7 = vld [vmem:[#allocation2 + $0x148] sm:$0xff]  ;;  %894 = vst.msk [vmem:[#allocation2 + $0x178] sm:$0xff] %vm19_vm0, %v829_v56  ;;  %v1057_v8 = vmax.f32 %v993_v59, 0.0  ;;  %v994_v10 = vadd.f32 %v1701_v1, %v923_v6  ;;  %860 = vst.msk [vmem:[#allocation2 + $0x68] sm:$0xff] %vm19_vm0, %v795_v63  ;;  %v134_v13 = vld [vmem:[#allocation2 + $0x190] sm:$0xff] }
 0x100   :  { %v1089_v9 = vmax.f32 %v1025_v60, 0.0  ;;  %v1026_v11 = vadd.f32 %v1701_v1, %v955_v7  ;;  %892 = vst.msk [vmem:[#allocation2 + $0x168] sm:$0xff] %vm19_vm0, %v827_v0  ;;  %1123 = vst.msk [vmem:[%s2082_s3 + $0x50] sm:$0xff] %vm19_vm0, %v1059_v2  ;;  %v1060_v14 = vmax.f32 %v996_v4, 0.0  ;;  %v132_v17 = vld [vmem:[#allocation2 + $0x180] sm:$0xff]  ;;  %v103_v22 = vld [vmem:[#allocation2 + $0x98] sm:$0xff] }
 0x101   :  { %1155 = vst.msk [vmem:[%s2082_s3 + $0x150] sm:$0xff] %vm19_vm0, %v1091_v3  ;;  %v1092_v15 = vmax.f32 %v1028_v5, 0.0  ;;  %1121 = vst.msk [vmem:[%s2082_s3 + $0x40] sm:$0xff] %vm19_vm0, %v1057_v8  ;;  %v1058_v18 = vmax.f32 %v994_v10, 0.0  ;;  %v1308_v20 = vpop.f32.mrb[16].mxu0  ;;  %v1340_v21 = vpop.f32.mrb[16].mxu1 }
 0x102   :  { %1153 = vst.msk [vmem:[%s2082_s3 + $0x140] sm:$0xff] %vm19_vm0, %v1089_v9  ;;  %v1090_v19 = vmax.f32 %v1026_v11, 0.0  ;;  %v135_v23 = vld [vmem:[#allocation2 + $0x198] sm:$0xff]  ;;  %1124 = vst.msk [vmem:[%s2082_s3 + $0x58] sm:$0xff] %vm19_vm0, %v1060_v14  ;;  %v800_v24 = vadd.f32 %v1308_v20, %v102_v12  ;;  %v832_v25 = vadd.f32 %v1340_v21, %v134_v13  ;;  %v591_v26 = vpop.f32.mrb[17].mxu0  ;;  %v719_v27 = vpop.f32.mrb[17].mxu1 }
 0x103   :  { %1156 = vst.msk [vmem:[%s2082_s3 + $0x158] sm:$0xff] %vm19_vm0, %v1092_v15  ;;  %v101_v28 = vld [vmem:[#allocation2 + $0x88] sm:$0xff]  ;;  %1122 = vst.msk [vmem:[%s2082_s3 + $0x48] sm:$0xff] %vm19_vm0, %v1058_v18  ;;  %v928_v30 = vld [vmem:[#allocation2 + $0x70] sm:$0xff]  ;;  %v798_v32 = vadd.f32 %v591_v26, %v100_v16  ;;  %v830_v33 = vadd.f32 %v719_v27, %v132_v17  ;;  %v1309_v34 = vpop.f32.mrb[18].mxu0  ;;  %v1341_v35 = vpop.f32.mrb[18].mxu1 }
 0x104   :  { %v133_v29 = vld [vmem:[#allocation2 + $0x188] sm:$0xff]  ;;  %1154 = vst.msk [vmem:[%s2082_s3 + $0x148] sm:$0xff] %vm19_vm0, %v1090_v19  ;;  %v960_v31 = vld [vmem:[#allocation2 + $0x170] sm:$0xff]  ;;  %v999_v36 = vadd.f32 %v1701_v1, %v928_v30  ;;  %v926_v38 = vld [vmem:[#allocation2 + $0x60] sm:$0xff]  ;;  %v801_v40 = vadd.f32 %v1309_v34, %v103_v22  ;;  %v833_v41 = vadd.f32 %v1341_v35, %v135_v23  ;;  %v594_v42 = vpop.f32.mrb[19].mxu0  ;;  %v722_v43 = vpop.f32.mrb[19].mxu1 }
 0x105   :  { %v1031_v37 = vadd.f32 %v1701_v1, %v960_v31  ;;  %v958_v39 = vld [vmem:[#allocation2 + $0x160] sm:$0xff]  ;;  %865 = vst.msk [vmem:[#allocation2 + $0x90] sm:$0xff] %vm19_vm0, %v800_v24  ;;  %897 = vst.msk [vmem:[#allocation2 + $0x190] sm:$0xff] %vm19_vm0, %v832_v25  ;;  %v997_v44 = vadd.f32 %v1701_v1, %v926_v38  ;;  %v929_v46 = vld [vmem:[#allocation2 + $0x78] sm:$0xff]  ;;  %v799_v48 = vadd.f32 %v594_v42, %v101_v28 }
 0x106   :  { %v1029_v45 = vadd.f32 %v1701_v1, %v958_v39  ;;  %v961_v47 = vld [vmem:[#allocation2 + $0x178] sm:$0xff]  ;;  %863 = vst.msk [vmem:[#allocation2 + $0x80] sm:$0xff] %vm19_vm0, %v798_v32  ;;  %895 = vst.msk [vmem:[#allocation2 + $0x180] sm:$0xff] %vm19_vm0, %v830_v33  ;;  %v831_v49 = vadd.f32 %v722_v43, %v133_v29  ;;  %v1063_v50 = vmax.f32 %v999_v36, 0.0  ;;  %v1000_v52 = vadd.f32 %v1701_v1, %v929_v46  ;;  %v927_v54 = vld [vmem:[#allocation2 + $0x68] sm:$0xff] }
 0x107   :  { %v1095_v51 = vmax.f32 %v1031_v37, 0.0  ;;  %v1032_v53 = vadd.f32 %v1701_v1, %v961_v47  ;;  %v959_v55 = vld [vmem:[#allocation2 + $0x168] sm:$0xff]  ;;  %866 = vst.msk [vmem:[#allocation2 + $0x98] sm:$0xff] %vm19_vm0, %v801_v40  ;;  %898 = vst.msk [vmem:[#allocation2 + $0x198] sm:$0xff] %vm19_vm0, %v833_v41  ;;  %v1061_v56 = vmax.f32 %v997_v44, 0.0  ;;  %v998_v58 = vadd.f32 %v1701_v1, %v927_v54  ;;  %v106_v60 = vld [vmem:[#allocation2 + $0xb0] sm:$0xff] }
 0x108   :  { %v1093_v57 = vmax.f32 %v1029_v45, 0.0  ;;  %v1030_v59 = vadd.f32 %v1701_v1, %v959_v55  ;;  %864 = vst.msk [vmem:[#allocation2 + $0x88] sm:$0xff] %vm19_vm0, %v799_v48  ;;  %896 = vst.msk [vmem:[#allocation2 + $0x188] sm:$0xff] %vm19_vm0, %v831_v49  ;;  %v138_v61 = vld [vmem:[#allocation2 + $0x1b0] sm:$0xff]  ;;  %v1064_v62 = vmax.f32 %v1000_v52, 0.0  ;;  %v104_v0 = vld [vmem:[#allocation2 + $0xa0] sm:$0xff] }
 0x109   :  { %1127 = vst.msk [vmem:[%s2082_s3 + $0x70] sm:$0xff] %vm19_vm0, %v1063_v50  ;;  %1159 = vst.msk [vmem:[%s2082_s3 + $0x170] sm:$0xff] %vm19_vm0, %v1095_v51  ;;  %v1096_v63 = vmax.f32 %v1032_v53, 0.0  ;;  %v136_v2 = vld [vmem:[#allocation2 + $0x1a0] sm:$0xff]  ;;  %v1062_v3 = vmax.f32 %v998_v58, 0.0  ;;  %v1312_v5 = vpop.f32.mrb[20].mxu0 }
 0x10a   :  { %1125 = vst.msk [vmem:[%s2082_s3 + $0x60] sm:$0xff] %vm19_vm0, %v1061_v56  ;;  %1157 = vst.msk [vmem:[%s2082_s3 + $0x160] sm:$0xff] %vm19_vm0, %v1093_v57  ;;  %v1094_v4 = vmax.f32 %v1030_v59, 0.0  ;;  %v1344_v6 = vpop.f32.mrb[20].mxu1  ;;  %v107_v7 = vld [vmem:[#allocation2 + $0xb8] sm:$0xff]  ;;  %v804_v9 = vadd.f32 %v1312_v5, %v106_v60  ;;  %v607_v11 = vpop.f32.mrb[21].mxu0 }
 0x10b   :  { %v139_v8 = vld [vmem:[#allocation2 + $0x1b8] sm:$0xff]  ;;  %1128 = vst.msk [vmem:[%s2082_s3 + $0x78] sm:$0xff] %vm19_vm0, %v1064_v62  ;;  %1160 = vst.msk [vmem:[%s2082_s3 + $0x178] sm:$0xff] %vm19_vm0, %v1096_v63  ;;  %v836_v10 = vadd.f32 %v1344_v6, %v138_v61  ;;  %v735_v12 = vpop.f32.mrb[21].mxu1  ;;  %v105_v13 = vld [vmem:[#allocation2 + $0xa8] sm:$0xff]  ;;  %v802_v17 = vadd.f32 %v607_v11, %v104_v0  ;;  %v1313_v19 = vpop.f32.mrb[22].mxu0 }
 0x10c   :  { %v137_v14 = vld [vmem:[#allocation2 + $0x1a8] sm:$0xff]  ;;  %1126 = vst.msk [vmem:[%s2082_s3 + $0x68] sm:$0xff] %vm19_vm0, %v1062_v3  ;;  %1158 = vst.msk [vmem:[%s2082_s3 + $0x168] sm:$0xff] %vm19_vm0, %v1094_v4  ;;  %v932_v15 = vld [vmem:[#allocation2 + $0x90] sm:$0xff]  ;;  %v834_v18 = vadd.f32 %v735_v12, %v136_v2  ;;  %v1345_v20 = vpop.f32.mrb[22].mxu1  ;;  %v805_v25 = vadd.f32 %v1313_v19, %v107_v7  ;;  %v610_v27 = vpop.f32.mrb[23].mxu0 }
 0x10d   :  { %v964_v16 = vld [vmem:[#allocation2 + $0x190] sm:$0xff]  ;;  %v1003_v21 = vadd.f32 %v1701_v1, %v932_v15  ;;  %v930_v23 = vld [vmem:[#allocation2 + $0x80] sm:$0xff]  ;;  %869 = vst.msk [vmem:[#allocation2 + $0xb0] sm:$0xff] %vm19_vm0, %v804_v9  ;;  %901 = vst.msk [vmem:[#allocation2 + $0x1b0] sm:$0xff] %vm19_vm0, %v836_v10  ;;  %v837_v26 = vadd.f32 %v1345_v20, %v139_v8  ;;  %v738_v28 = vpop.f32.mrb[23].mxu1  ;;  %v803_v33 = vadd.f32 %v610_v27, %v105_v13 }
 0x10e   :  { %v1035_v22 = vadd.f32 %v1701_v1, %v964_v16  ;;  %v962_v24 = vld [vmem:[#allocation2 + $0x180] sm:$0xff]  ;;  %v1001_v29 = vadd.f32 %v1701_v1, %v930_v23  ;;  %v933_v31 = vld [vmem:[#allocation2 + $0x98] sm:$0xff]  ;;  %867 = vst.msk [vmem:[#allocation2 + $0xa0] sm:$0xff] %vm19_vm0, %v802_v17  ;;  %899 = vst.msk [vmem:[#allocation2 + $0x1a0] sm:$0xff] %vm19_vm0, %v834_v18  ;;  %v835_v34 = vadd.f32 %v738_v28, %v137_v14 }
 0x10f   :  { %v1033_v30 = vadd.f32 %v1701_v1, %v962_v24  ;;  %v965_v32 = vld [vmem:[#allocation2 + $0x198] sm:$0xff]  ;;  %v1067_v35 = vmax.f32 %v1003_v21, 0.0  ;;  %v1004_v37 = vadd.f32 %v1701_v1, %v933_v31  ;;  %v931_v39 = vld [vmem:[#allocation2 + $0x88] sm:$0xff]  ;;  %870 = vst.msk [vmem:[#allocation2 + $0xb8] sm:$0xff] %vm19_vm0, %v805_v25  ;;  %902 = vst.msk [vmem:[#allocation2 + $0x1b8] sm:$0xff] %vm19_vm0, %v837_v26 }
 0x110   :  { %v1099_v36 = vmax.f32 %v1035_v22, 0.0  ;;  %v1036_v38 = vadd.f32 %v1701_v1, %v965_v32  ;;  %v963_v40 = vld [vmem:[#allocation2 + $0x188] sm:$0xff]  ;;  %v1065_v41 = vmax.f32 %v1001_v29, 0.0  ;;  %v1002_v43 = vadd.f32 %v1701_v1, %v931_v39  ;;  %868 = vst.msk [vmem:[#allocation2 + $0xa8] sm:$0xff] %vm19_vm0, %v803_v33  ;;  %900 = vst.msk [vmem:[#allocation2 + $0x1a8] sm:$0xff] %vm19_vm0, %v835_v34  ;;  %v110_v45 = vld [vmem:[#allocation2 + $0xd0] sm:$0xff] }
 0x111   :  { %v1097_v42 = vmax.f32 %v1033_v30, 0.0  ;;  %v1034_v44 = vadd.f32 %v1701_v1, %v963_v40  ;;  %v142_v46 = vld [vmem:[#allocation2 + $0x1d0] sm:$0xff]  ;;  %1131 = vst.msk [vmem:[%s2082_s3 + $0x90] sm:$0xff] %vm19_vm0, %v1067_v35  ;;  %v1068_v47 = vmax.f32 %v1004_v37, 0.0  ;;  %v108_v49 = vld [vmem:[#allocation2 + $0xc0] sm:$0xff]  ;;  %v1316_v53 = vpop.f32.mrb[24].mxu0 }
 0x112   :  { %1163 = vst.msk [vmem:[%s2082_s3 + $0x190] sm:$0xff] %vm19_vm0, %v1099_v36  ;;  %v1100_v48 = vmax.f32 %v1036_v38, 0.0  ;;  %v140_v50 = vld [vmem:[#allocation2 + $0x1c0] sm:$0xff]  ;;  %1129 = vst.msk [vmem:[%s2082_s3 + $0x80] sm:$0xff] %vm19_vm0, %v1065_v41  ;;  %v1066_v51 = vmax.f32 %v1002_v43, 0.0  ;;  %v1348_v54 = vpop.f32.mrb[24].mxu1  ;;  %v808_v57 = vadd.f32 %v1316_v53, %v110_v45 }
 0x113   :  { %1161 = vst.msk [vmem:[%s2082_s3 + $0x180] sm:$0xff] %vm19_vm0, %v1097_v42  ;;  %v1098_v52 = vmax.f32 %v1034_v44, 0.0  ;;  %v111_v55 = vld [vmem:[#allocation2 + $0xd8] sm:$0xff]  ;;  %1132 = vst.msk [vmem:[%s2082_s3 + $0x98] sm:$0xff] %vm19_vm0, %v1068_v47  ;;  %v840_v58 = vadd.f32 %v1348_v54, %v142_v46  ;;  %v623_v59 = vpop.f32.mrb[25].mxu0  ;;  %v751_v60 = vpop.f32.mrb[25].mxu1 }
 0x114   :  { %v143_v56 = vld [vmem:[#allocation2 + $0x1d8] sm:$0xff]  ;;  %1164 = vst.msk [vmem:[%s2082_s3 + $0x198] sm:$0xff] %vm19_vm0, %v1100_v48  ;;  %v109_v61 = vld [vmem:[#allocation2 + $0xc8] sm:$0xff]  ;;  %1130 = vst.msk [vmem:[%s2082_s3 + $0x88] sm:$0xff] %vm19_vm0, %v1066_v51  ;;  %v806_v2 = vadd.f32 %v623_v59, %v108_v49  ;;  %v838_v3 = vadd.f32 %v751_v60, %v140_v50  ;;  %v1317_v4 = vpop.f32.mrb[26].mxu0  ;;  %v1349_v5 = vpop.f32.mrb[26].mxu1 }
 0x115   :  { %v141_v62 = vld [vmem:[#allocation2 + $0x1c8] sm:$0xff]  ;;  %1162 = vst.msk [vmem:[%s2082_s3 + $0x188] sm:$0xff] %vm19_vm0, %v1098_v52  ;;  %v936_v63 = vld [vmem:[#allocation2 + $0xb0] sm:$0xff]  ;;  %v934_v8 = vld [vmem:[#allocation2 + $0xa0] sm:$0xff]  ;;  %v809_v10 = vadd.f32 %v1317_v4, %v111_v55  ;;  %v841_v11 = vadd.f32 %v1349_v5, %v143_v56  ;;  %v626_v12 = vpop.f32.mrb[27].mxu0  ;;  %v754_v13 = vpop.f32.mrb[27].mxu1 }
 0x116   :  { %v968_v0 = vld [vmem:[#allocation2 + $0x1b0] sm:$0xff]  ;;  %v1007_v6 = vadd.f32 %v1701_v1, %v936_v63  ;;  %v966_v9 = vld [vmem:[#allocation2 + $0x1a0] sm:$0xff]  ;;  %873 = vst.msk [vmem:[#allocation2 + $0xd0] sm:$0xff] %vm19_vm0, %v808_v57  ;;  %905 = vst.msk [vmem:[#allocation2 + $0x1d0] sm:$0xff] %vm19_vm0, %v840_v58  ;;  %v1005_v14 = vadd.f32 %v1701_v1, %v934_v8  ;;  %v807_v18 = vadd.f32 %v626_v12, %v109_v61 }
 0x117   :  { %v1039_v7 = vadd.f32 %v1701_v1, %v968_v0  ;;  %v1037_v15 = vadd.f32 %v1701_v1, %v966_v9  ;;  %v937_v16 = vld [vmem:[#allocation2 + $0xb8] sm:$0xff]  ;;  %871 = vst.msk [vmem:[#allocation2 + $0xc0] sm:$0xff] %vm19_vm0, %v806_v2  ;;  %903 = vst.msk [vmem:[#allocation2 + $0x1c0] sm:$0xff] %vm19_vm0, %v838_v3  ;;  %v839_v19 = vadd.f32 %v754_v13, %v141_v62  ;;  %v935_v24 = vld [vmem:[#allocation2 + $0xa8] sm:$0xff] }
 0x118   :  { %v969_v17 = vld [vmem:[#allocation2 + $0x1b8] sm:$0xff]  ;;  %v1071_v20 = vmax.f32 %v1007_v6, 0.0  ;;  %v1008_v22 = vadd.f32 %v1701_v1, %v937_v16  ;;  %v967_v25 = vld [vmem:[#allocation2 + $0x1a8] sm:$0xff]  ;;  %874 = vst.msk [vmem:[#allocation2 + $0xd8] sm:$0xff] %vm19_vm0, %v809_v10  ;;  %906 = vst.msk [vmem:[#allocation2 + $0x1d8] sm:$0xff] %vm19_vm0, %v841_v11  ;;  %v1069_v26 = vmax.f32 %v1005_v14, 0.0  ;;  %v1006_v28 = vadd.f32 %v1701_v1, %v935_v24 }
 0x119   :  { %v1103_v21 = vmax.f32 %v1039_v7, 0.0  ;;  %v1040_v23 = vadd.f32 %v1701_v1, %v969_v17  ;;  %v1101_v27 = vmax.f32 %v1037_v15, 0.0  ;;  %v1038_v29 = vadd.f32 %v1701_v1, %v967_v25  ;;  %872 = vst.msk [vmem:[#allocation2 + $0xc8] sm:$0xff] %vm19_vm0, %v807_v18  ;;  %904 = vst.msk [vmem:[#allocation2 + $0x1c8] sm:$0xff] %vm19_vm0, %v839_v19  ;;  %v114_v30 = vld [vmem:[#allocation2 + $0xf0] sm:$0xff]  ;;  %v112_v34 = vld [vmem:[#allocation2 + $0xe0] sm:$0xff] }
 0x11a   :  { %v146_v31 = vld [vmem:[#allocation2 + $0x1f0] sm:$0xff]  ;;  %1135 = vst.msk [vmem:[%s2082_s3 + $0xb0] sm:$0xff] %vm19_vm0, %v1071_v20  ;;  %v1072_v32 = vmax.f32 %v1008_v22, 0.0  ;;  %v144_v35 = vld [vmem:[#allocation2 + $0x1e0] sm:$0xff]  ;;  %1133 = vst.msk [vmem:[%s2082_s3 + $0xa0] sm:$0xff] %vm19_vm0, %v1069_v26  ;;  %v1070_v36 = vmax.f32 %v1006_v28, 0.0 }
 0x11b   :  { %1167 = vst.msk [vmem:[%s2082_s3 + $0x1b0] sm:$0xff] %vm19_vm0, %v1103_v21  ;;  %v1104_v33 = vmax.f32 %v1040_v23, 0.0  ;;  %1165 = vst.msk [vmem:[%s2082_s3 + $0x1a0] sm:$0xff] %vm19_vm0, %v1101_v27  ;;  %v1102_v37 = vmax.f32 %v1038_v29, 0.0  ;;  %v1320_v38 = vpop.f32.mrb[28].mxu0  ;;  %v1352_v39 = vpop.f32.mrb[28].mxu1 }
 0x11c   :  { %v115_v40 = vld [vmem:[#allocation2 + $0xf8] sm:$0xff]  ;;  %1136 = vst.msk [vmem:[%s2082_s3 + $0xb8] sm:$0xff] %vm19_vm0, %v1072_v32  ;;  %v812_v42 = vadd.f32 %v1320_v38, %v114_v30  ;;  %v844_v43 = vadd.f32 %v1352_v39, %v146_v31  ;;  %v639_v44 = vpop.f32.mrb[29].mxu0  ;;  %v767_v45 = vpop.f32.mrb[29].mxu1  ;;  %v113_v46 = vld [vmem:[#allocation2 + $0xe8] sm:$0xff]  ;;  %1134 = vst.msk [vmem:[%s2082_s3 + $0xa8] sm:$0xff] %vm19_vm0, %v1070_v36 }
 0x11d   :  { %v147_v41 = vld [vmem:[#allocation2 + $0x1f8] sm:$0xff]  ;;  %1168 = vst.msk [vmem:[%s2082_s3 + $0x1b8] sm:$0xff] %vm19_vm0, %v1104_v33  ;;  %v145_v47 = vld [vmem:[#allocation2 + $0x1e8] sm:$0xff]  ;;  %1166 = vst.msk [vmem:[%s2082_s3 + $0x1a8] sm:$0xff] %vm19_vm0, %v1102_v37  ;;  %v810_v50 = vadd.f32 %v639_v44, %v112_v34  ;;  %v842_v51 = vadd.f32 %v767_v45, %v144_v35  ;;  %v1321_v52 = vpop.f32.mrb[30].mxu0  ;;  %v1353_v53 = vpop.f32.mrb[30].mxu1 }
 0x11e   :  { %v940_v48 = vld [vmem:[#allocation2 + $0xd0] sm:$0xff]  ;;  %v938_v56 = vld [vmem:[#allocation2 + $0xc0] sm:$0xff]  ;;  %877 = vst.msk [vmem:[#allocation2 + $0xf0] sm:$0xff] %vm19_vm0, %v812_v42  ;;  %909 = vst.msk [vmem:[#allocation2 + $0x1f0] sm:$0xff] %vm19_vm0, %v844_v43  ;;  %v813_v58 = vadd.f32 %v1321_v52, %v115_v40  ;;  %v845_v59 = vadd.f32 %v1353_v53, %v147_v41  ;;  %v642_v60 = vpop.f32.mrb[31].mxu0  ;;  %v770_v61 = vpop.f32.mrb[31].mxu1 }
 0x11f   :  { %v972_v49 = vld [vmem:[#allocation2 + $0x1d0] sm:$0xff]  ;;  %v1011_v54 = vadd.f32 %v1701_v1, %v940_v48  ;;  %v970_v57 = vld [vmem:[#allocation2 + $0x1c0] sm:$0xff]  ;;  %v1009_v62 = vadd.f32 %v1701_v1, %v938_v56  ;;  %v941_v0 = vld [vmem:[#allocation2 + $0xd8] sm:$0xff]  ;;  %875 = vst.msk [vmem:[#allocation2 + $0xe0] sm:$0xff] %vm19_vm0, %v810_v50  ;;  %v811_v3 = vadd.f32 %v642_v60, %v113_v46  ;;  %v843_v4 = vadd.f32 %v770_v61, %v145_v47 }
 0x120   :  { %v1043_v55 = vadd.f32 %v1701_v1, %v972_v49  ;;  %v1041_v63 = vadd.f32 %v1701_v1, %v970_v57  ;;  %v973_v2 = vld [vmem:[#allocation2 + $0x1d8] sm:$0xff]  ;;  %907 = vst.msk [vmem:[#allocation2 + $0x1e0] sm:$0xff] %vm19_vm0, %v842_v51  ;;  %v1012_v7 = vadd.f32 %v1701_v1, %v941_v0  ;;  %v939_v9 = vld [vmem:[#allocation2 + $0xc8] sm:$0xff]  ;;  %878 = vst.msk [vmem:[#allocation2 + $0xf8] sm:$0xff] %vm19_vm0, %v813_v58 }
 0x121   :  { %v1075_v5 = vmax.f32 %v1011_v54, 0.0  ;;  %v1044_v8 = vadd.f32 %v1701_v1, %v973_v2  ;;  %v971_v10 = vld [vmem:[#allocation2 + $0x1c8] sm:$0xff]  ;;  %910 = vst.msk [vmem:[#allocation2 + $0x1f8] sm:$0xff] %vm19_vm0, %v845_v59  ;;  %v1073_v11 = vmax.f32 %v1009_v62, 0.0  ;;  %v1010_v13 = vadd.f32 %v1701_v1, %v939_v9  ;;  %876 = vst.msk [vmem:[#allocation2 + $0xe8] sm:$0xff] %vm19_vm0, %v811_v3 }
 0x122   :  { %v1107_v6 = vmax.f32 %v1043_v55, 0.0  ;;  %v1105_v12 = vmax.f32 %v1041_v63, 0.0  ;;  %v1042_v14 = vadd.f32 %v1701_v1, %v971_v10  ;;  %908 = vst.msk [vmem:[#allocation2 + $0x1e8] sm:$0xff] %vm19_vm0, %v843_v4  ;;  %v1076_v15 = vmax.f32 %v1012_v7, 0.0 }
 0x123   :  { %1139 = vst.msk [vmem:[%s2082_s3 + $0xd0] sm:$0xff] %vm19_vm0, %v1075_v5  ;;  %v1108_v16 = vmax.f32 %v1044_v8, 0.0  ;;  %1137 = vst.msk [vmem:[%s2082_s3 + $0xc0] sm:$0xff] %vm19_vm0, %v1073_v11  ;;  %v1074_v17 = vmax.f32 %v1010_v13, 0.0 }
 0x124   :  { %1171 = vst.msk [vmem:[%s2082_s3 + $0x1d0] sm:$0xff] %vm19_vm0, %v1107_v6  ;;  %1169 = vst.msk [vmem:[%s2082_s3 + $0x1c0] sm:$0xff] %vm19_vm0, %v1105_v12  ;;  %v1106_v18 = vmax.f32 %v1042_v14, 0.0 }
 0x125   :  { %1140 = vst.msk [vmem:[%s2082_s3 + $0xd8] sm:$0xff] %vm19_vm0, %v1076_v15  ;;  %1172 = vst.msk [vmem:[%s2082_s3 + $0x1d8] sm:$0xff] %vm19_vm0, %v1108_v16  ;;  %v944_v19 = vld [vmem:[#allocation2 + $0xf0] sm:$0xff] }
 0x126   :  { %1138 = vst.msk [vmem:[%s2082_s3 + $0xc8] sm:$0xff] %vm19_vm0, %v1074_v17  ;;  %1170 = vst.msk [vmem:[%s2082_s3 + $0x1c8] sm:$0xff] %vm19_vm0, %v1106_v18  ;;  %v976_v20 = vld [vmem:[#allocation2 + $0x1f0] sm:$0xff]  ;;  %v1015_v21 = vadd.f32 %v1701_v1, %v944_v19  ;;  %v942_v23 = vld [vmem:[#allocation2 + $0xe0] sm:$0xff] }
 0x127   :  { %v1047_v22 = vadd.f32 %v1701_v1, %v976_v20  ;;  %v974_v24 = vld [vmem:[#allocation2 + $0x1e0] sm:$0xff]  ;;  %v1013_v25 = vadd.f32 %v1701_v1, %v942_v23  ;;  %v945_v27 = vld [vmem:[#allocation2 + $0xf8] sm:$0xff] }
 0x128   :  { %v1045_v26 = vadd.f32 %v1701_v1, %v974_v24  ;;  %v977_v28 = vld [vmem:[#allocation2 + $0x1f8] sm:$0xff]  ;;  %v1079_v29 = vmax.f32 %v1015_v21, 0.0  ;;  %v1016_v31 = vadd.f32 %v1701_v1, %v945_v27  ;;  %v943_v33 = vld [vmem:[#allocation2 + $0xe8] sm:$0xff] }
 0x129   :  { %v1111_v30 = vmax.f32 %v1047_v22, 0.0  ;;  %v1048_v32 = vadd.f32 %v1701_v1, %v977_v28  ;;  %v975_v34 = vld [vmem:[#allocation2 + $0x1e8] sm:$0xff]  ;;  %v1077_v35 = vmax.f32 %v1013_v25, 0.0  ;;  %v1014_v37 = vadd.f32 %v1701_v1, %v943_v33 }
 0x12a   :  { %v1109_v36 = vmax.f32 %v1045_v26, 0.0  ;;  %v1046_v38 = vadd.f32 %v1701_v1, %v975_v34  ;;  %1143 = vst.msk [vmem:[%s2082_s3 + $0xf0] sm:$0xff] %vm19_vm0, %v1079_v29  ;;  %v1080_v39 = vmax.f32 %v1016_v31, 0.0 }
 0x12b   :  { %1175 = vst.msk [vmem:[%s2082_s3 + $0x1f0] sm:$0xff] %vm19_vm0, %v1111_v30  ;;  %v1112_v40 = vmax.f32 %v1048_v32, 0.0  ;;  %1141 = vst.msk [vmem:[%s2082_s3 + $0xe0] sm:$0xff] %vm19_vm0, %v1077_v35  ;;  %v1078_v1 = vmax.f32 %v1014_v37, 0.0 }
 0x12c   :  { %1173 = vst.msk [vmem:[%s2082_s3 + $0x1e0] sm:$0xff] %vm19_vm0, %v1109_v36  ;;  %v1110_v41 = vmax.f32 %v1046_v38, 0.0  ;;  %1144 = vst.msk [vmem:[%s2082_s3 + $0xf8] sm:$0xff] %vm19_vm0, %v1080_v39 }
 0x12d   :  { %1176 = vst.msk [vmem:[%s2082_s3 + $0x1f8] sm:$0xff] %vm19_vm0, %v1112_v40  ;;  %1142 = vst.msk [vmem:[%s2082_s3 + $0xe8] sm:$0xff] %vm19_vm0, %v1078_v1 }
 0x12e   :  { %1174 = vst.msk [vmem:[%s2082_s3 + $0x1e8] sm:$0xff] %vm19_vm0, %v1110_v41 }

</bundles_post_ra>
